<compile_context>
chip_gen: v5e
topology: v5e:2x2
jax: 0.10.0
libtpu: 0.0.40
codegen_flags: <defaults>
</compile_context>

<pallas_src>
import functools

import jax
import jax.numpy as jnp
import numpy as np
from jax.experimental import pallas as pl
from jax.experimental.pallas import tpu as pltpu


# ---------------------------------------------------------------------------
# Fixed-point "integer" quantizer (forward semantics of mase integer_quantizer)
#   q(x) = clamp(round(x * 2^f), -2^(w-1), 2^(w-1)-1) / 2^f
# `pre_scale` folds an extra scalar multiply (e.g. 1/sqrt(d)) into the scale.
# ---------------------------------------------------------------------------
def int_quant(x, width, frac_width, pre_scale=1.0):
    mul = float(pre_scale) * float(2.0 ** frac_width)
    inv = float(2.0 ** (-frac_width))
    lo = float(-(2 ** (width - 1)))
    hi = float(2 ** (width - 1) - 1)
    return jnp.clip(jnp.round(x * mul), lo, hi) * inv


def _quant_to_int8(x, width, frac_width, pre_scale=1.0):
    """Same quantizer, but returns the integer code (width <= 8) as int8."""
    mul = float(pre_scale) * float(2.0 ** frac_width)
    lo = -(2 ** (width - 1))
    hi = 2 ** (width - 1) - 1
    return jnp.clip(jnp.round(x * mul), lo, hi).astype(jnp.int8)


def _exact_in_bf16(*widths):
    # <=8-bit fixed-point values are small integers times a power of two, so
    # they are exactly representable in bfloat16 (products exact in f32).
    return all(w <= 8 for w in widths)


def _supports_int8_mxu():
    """int8 MXU only on v5e/v6e (2x bf16 throughput, half the weight bytes).
    v7x has no integer MXU (and fp8 is not a drop-in for fixed point); unknown
    backends stay on the always-correct bf16 path."""
    try:
        kind = jax.devices()[0].device_kind.lower()
    except Exception:
        return False
    return ("v5" in kind) or ("v6" in kind)


def _linear_mode(cfg, int8_ok):
    if cfg["data_in_width"] <= 8 and cfg["weight_width"] <= 8:
        return "int8" if int8_ok else "bf16"
    return "f32"  # wide fixed point: exact f32 matmul


def _pick_tile(dim, target, align):
    """Largest aligned divisor of `dim` that is <= target (or the full dim)."""
    if dim <= target:
        return dim
    t = (target // align) * align
    while t >= align:
        if dim % t == 0:
            return t
        t -= align
    return dim


def _vmem_limit(est_bytes):
    # computed from the actual block sizes (not hard-coded); capped so the
    # scoped limit stays inside v7x's 64 MiB physical VMEM.
    return int(min(max(2 * est_bytes, 32 << 20), 64 << 20))


_MATMUL_SEMANTICS = ("parallel", "parallel", "arbitrary")


def _mm(a, w, mode):
    """Tile matmul used by the linear kernels."""
    if mode == "int8":
        return jnp.dot(a, w, preferred_element_type=jnp.int32)
    if mode == "bf16":
        return jnp.dot(a.astype(jnp.bfloat16), w.astype(jnp.bfloat16),
                       preferred_element_type=jnp.float32)
    return jnp.dot(a.astype(jnp.float32), w.astype(jnp.float32),
                   preferred_element_type=jnp.float32,
                   precision=jax.lax.Precision.HIGHEST)


def _dot_nt(a, b, use_bf16):
    """a (m, d) . b (n, d)^T: contract last dims (no explicit XLU transpose)."""
    dn = (((1,), (1,)), ((), ()))
    if use_bf16:
        return jax.lax.dot_general(a.astype(jnp.bfloat16), b.astype(jnp.bfloat16),
                                   dn, preferred_element_type=jnp.float32)
    return jax.lax.dot_general(a.astype(jnp.float32), b.astype(jnp.float32),
                               dn, preferred_element_type=jnp.float32,
                               precision=jax.lax.Precision.HIGHEST)


def _dot_nn(a, b, use_bf16):
    if use_bf16:
        return jnp.dot(a.astype(jnp.bfloat16), b.astype(jnp.bfloat16),
                       preferred_element_type=jnp.float32)
    return jnp.dot(a.astype(jnp.float32), b.astype(jnp.float32),
                   preferred_element_type=jnp.float32,
                   precision=jax.lax.Precision.HIGHEST)


# ---------------------------------------------------------------------------
# Parameter preparation (done ONCE, not per forward): quantize weights/biases,
# transpose, and cast to the MXU operand dtype (int8 codes or bf16 values).
# ---------------------------------------------------------------------------
def prepare_params(params, config, *, int8_ok=None):
    if int8_ok is None:
        int8_ok = _supports_int8_mxu()
    qkv_small = all(config[n]["data_in_width"] <= 8 and config[n]["weight_width"] <= 8
                    for n in ("q_proj", "k_proj", "v_proj"))
    qkv_mode = ("int8" if int8_ok else "bf16") if qkv_small else "f32"
    out_mode = _linear_mode(config["out_proj"], int8_ok)
    prep = {"qkv_mode": qkv_mode, "out_mode": out_mode, "int8_ok": int8_ok}
    for name, wk, bk in (("q_proj", "q_w", "q_b"), ("k_proj", "k_w", "k_b"),
                         ("v_proj", "v_w", "v_b"), ("out_proj", "out_w", "out_b")):
        cfg = config[name]
        mode = out_mode if name == "out_proj" else qkv_mode
        w, b = params[wk], params[bk]
        if mode == "int8":
            wt = _quant_to_int8(w, cfg["weight_width"], cfg["weight_frac_width"]).T
            acc_scale = 2.0 ** (-(cfg["data_in_frac_width"] + cfg["weight_frac_width"]))
        else:
            wt = int_quant(w, cfg["weight_width"], cfg["weight_frac_width"]).T
            if mode == "bf16":
                wt = wt.astype(jnp.bfloat16)
            acc_scale = 1.0
        bq = int_quant(b, cfg["bias_width"], cfg["bias_frac_width"]).reshape(1, -1)
        prep[name] = dict(mode=mode, wt=wt, b=bq, acc_scale=acc_scale)
    return prep


# ---------------------------------------------------------------------------
# Generic tiled linear (used for out_proj): x is ALREADY passed through the
# data_in quantizer (int8 codes / bf16 values).  y = x_q @ W_q^T + b_q.
# ---------------------------------------------------------------------------
def _linear_kernel(x_ref, wt_ref, b_ref, o_ref, acc_ref, *, mode, acc_scale):
    @pl.when(pl.program_id(2) == 0)
    def _():
        acc_ref[...] = jnp.zeros_like(acc_ref)

    acc_ref[...] += _mm(x_ref[...], wt_ref[...], mode)

    @pl.when(pl.program_id(2) == pl.num_programs(2) - 1)
    def _():
        y = acc_ref[...].astype(jnp.float32)
        if acc_scale != 1.0:                  # int8 path: 2^-(f_in + f_w)
            y = y * acc_scale
        o_ref[...] = (y + b_ref[...]).astype(o_ref.dtype)


def quant_linear(x2d, wt, b_row, *, mode, acc_scale, out_dtype=jnp.float32,
                 tm=256, tn=512, tk=512):
    M, K = x2d.shape
    N = wt.shape[1]
    tm = _pick_tile(M, tm, 8)
    tn = _pick_tile(N, tn, 128)
    tk = _pick_tile(K, tk, 128)
    acc_dtype = jnp.int32 if mode == "int8" else jnp.float32
    est = (2 * tm * tk * x2d.dtype.itemsize + 2 * tk * tn * wt.dtype.itemsize
           + 2 * tn * 4 + 2 * tm * tn * jnp.dtype(out_dtype).itemsize
           + tm * tn * 4)
    kern = functools.partial(_linear_kernel, mode=mode, acc_scale=acc_scale)
    return pl.pallas_call(
        kern,
        out_shape=jax.ShapeDtypeStruct((M, N), out_dtype),
        grid=(M // tm, N // tn, K // tk),
        in_specs=[pl.BlockSpec((tm, tk), lambda i, j, k: (i, k)),
                  pl.BlockSpec((tk, tn), lambda i, j, k: (k, j)),
                  pl.BlockSpec((1, tn), lambda i, j, k: (0, j))],
        out_specs=pl.BlockSpec((tm, tn), lambda i, j, k: (i, j)),
        scratch_shapes=[pltpu.VMEM((tm, tn), acc_dtype)],
        compiler_params=pltpu.CompilerParams(
            dimension_semantics=_MATMUL_SEMANTICS,
            vmem_limit_bytes=_vmem_limit(est)),
    )(x2d, wt, b_row)


# ---------------------------------------------------------------------------
# Fused Q/K/V projection: one kernel, x read once per tile, three MXU matmuls,
# three outputs already passed through the downstream bmm quantizers
# (1/sqrt(d) folded into q's quantizer scale).
# ---------------------------------------------------------------------------
def _qkv_kernel(x_ref, wq_ref, wk_ref, wv_ref, bq_ref, bk_ref, bv_ref,
                qo_ref, ko_ref, vo_ref, qacc, kacc, vacc, *,
                mode, in_q, acc_scales, post_q):
    @pl.when(pl.program_id(2) == 0)
    def _():
        qacc[...] = jnp.zeros_like(qacc)
        kacc[...] = jnp.zeros_like(kacc)
        vacc[...] = jnp.zeros_like(vacc)

    x = x_ref[...]
    cache = {}

    def operand(i):
        qp = in_q[i]
        if qp is None:            # x already pre-quantized outside the kernel
            return x
        if qp not in cache:       # share the quantized tile across matching cfgs
            if mode == "int8":
                cache[qp] = _quant_to_int8(x, qp[0], qp[1])
            else:
                xq = int_quant(x, qp[0], qp[1])
                cache[qp] = xq.astype(jnp.bfloat16) if mode == "bf16" else xq
        return cache[qp]

    qacc[...] += _mm(operand(0), wq_ref[...], mode)
    kacc[...] += _mm(operand(1), wk_ref[...], mode)
    vacc[...] += _mm(operand(2), wv_ref[...], mode)

    @pl.when(pl.program_id(2) == pl.num_programs(2) - 1)
    def _():
        for acc, b_ref, o_ref, scale, (qw, qf, pre) in zip(
                (qacc, kacc, vacc), (bq_ref, bk_ref, bv_ref),
                (qo_ref, ko_ref, vo_ref), acc_scales, post_q):
            y = acc[...].astype(jnp.float32)
            if scale != 1.0:
                y = y * scale
            y = y + b_ref[...]
            # fold the downstream bmm quantizer into the epilogue so the
            # attention kernel never re-quantizes q/k/v
            o_ref[...] = int_quant(y, qw, qf, pre_scale=pre).astype(o_ref.dtype)


def fused_qkv_proj(x_in, prep, config, scaling, in_q, out_dtypes, *,
                   tm=256, tn=512, tk=512):
    M, K = x_in.shape
    N = prep["q_proj"]["wt"].shape[1]
    mode = prep["qkv_mode"]
    acfg = config["bmm_attention"]
    ccfg = config["bmm_context"]
    post_q = (
        (acfg["data_in_width"], acfg["data_in_frac_width"], scaling),  # q * 1/sqrt(d)
        (acfg["weight_width"], acfg["weight_frac_width"], 1.0),        # k
        (ccfg["weight_width"], ccfg["weight_frac_width"], 1.0),        # v
    )
    acc_scales = tuple(prep[n]["acc_scale"] for n in ("q_proj", "k_proj", "v_proj"))

    tm = _pick_tile(M, tm, 8)
    tn = _pick_tile(N, tn, 128)
    tk = _pick_tile(K, tk, 128)
    acc_dtype = jnp.int32 if mode == "int8" else jnp.float32
    w_bytes = prep["q_proj"]["wt"].dtype.itemsize
    est = (2 * tm * tk * x_in.dtype.itemsize + 3 * 2 * tk * tn * w_bytes
           + 3 * 2 * tn * 4
           + sum(2 * tm * tn * jnp.dtype(d).itemsize for d in out_dtypes)
           + 3 * tm * tn * 4)

    kern = functools.partial(_qkv_kernel, mode=mode, in_q=in_q,
                             acc_scales=acc_scales, post_q=post_q)
    x_spec = pl.BlockSpec((tm, tk), lambda i, j, k: (i, k))
    w_spec = pl.BlockSpec((tk, tn), lambda i, j, k: (k, j))
    b_spec = pl.BlockSpec((1, tn), lambda i, j, k: (0, j))
    o_spec = pl.BlockSpec((tm, tn), lambda i, j, k: (i, j))
    return pl.pallas_call(
        kern,
        out_shape=tuple(jax.ShapeDtypeStruct((M, N), d) for d in out_dtypes),
        grid=(M // tm, N // tn, K // tk),
        in_specs=[x_spec, w_spec, w_spec, w_spec, b_spec, b_spec, b_spec],
        out_specs=(o_spec, o_spec, o_spec),
        scratch_shapes=[pltpu.VMEM((tm, tn), acc_dtype) for _ in range(3)],
        compiler_params=pltpu.CompilerParams(
            dimension_semantics=_MATMUL_SEMANTICS,
            vmem_limit_bytes=_vmem_limit(est)),
    )(x_in, prep["q_proj"]["wt"], prep["k_proj"]["wt"], prep["v_proj"]["wt"],
      prep["q_proj"]["b"], prep["k_proj"]["b"], prep["v_proj"]["b"])


# ---------------------------------------------------------------------------
# Attention over a (batch, head-group, query-tile) grid.  q/k/v arrive already
# quantized (bf16 values); per head:
#   q . k^T (contract last dims) -> +mask -> clamp(finfo.min) -> softmax
#   -> quantize(p) -> p_q @ v -> out_proj data_in quantize -> store.
# The mask is streamed in (1, tq, S) blocks; scores only ever exist as one
# (tq, S) tile per head, so the working set is VMEM-budgeted even at T=2048.
# ---------------------------------------------------------------------------
def attn_kernel(q_ref, k_ref, v_ref, mask_ref, o_ref, *, n_heads_blk, head_dim,
                pw, pf, ow, of, use_bf16):
    D = head_dim
    mask = mask_ref[0]                       # (tq, S), shared by all heads in block
    neg_cap = jnp.float32(jnp.finfo(jnp.float32).min)
    # small static loop over heads; per-head stores bound live ranges to one
    # (tq, S) score tile at a time
    for h in range(n_heads_blk):
        lo = h * D
        q = q_ref[:, lo:lo + D]              # pre-quantized (incl. 1/sqrt(d)) values
        k = k_ref[:, lo:lo + D]
        v = v_ref[:, lo:lo + D]
        s = _dot_nt(q, k, use_bf16) + mask   # (tq, S)
        s = jnp.maximum(s, neg_cap)
        s = s - jnp.max(s, axis=-1, keepdims=True)
        e = jnp.exp(s)
        inv = pl.reciprocal(jnp.sum(e, axis=-1, keepdims=True), approx=True)
        p = int_quant(e * inv, pw, pf)       # bmm_context data_in quantizer
        # TODO(synk): dropout(p) is a no-op here (module config uses p=0.0).
        ctx = _dot_nn(p, v, use_bf16)        # (tq, D)
        # fold out_proj's data_in quantizer into the store
        o_ref[:, lo:lo + D] = int_quant(ctx, ow, of).astype(o_ref.dtype)
    # TODO(synk): for S beyond ~8k, stream K/V/mask over S blocks with a
    # two-pass (m,l then p@v) softmax.  A single-pass online-softmax rescale is
    # NOT used because the module quantizes p with the full-row normalizer.


def _attn_tiles(B, T, H, D, in_bytes, out_bytes, budget=24 << 20):
    """Pick (heads_per_block, query_tile) so the working set stays VMEM-resident.
    Head groups must give a lane-dense minor dim (multiple of 128) or the full
    embed dim; the budget covers q/k/v/mask double buffers + one score tile."""
    cands = [hb for hb in range(1, H + 1)
             if H % hb == 0 and (hb * D) % 128 == 0]
    if not cands:
        cands = [H]               # hb*D == E: the only legal minor-dim block
    dense = [hb for hb in cands if hb * D <= 512]
    if dense:
        cands = dense

    def est(hb, tq):
        hbd = hb * D
        return (2 * tq * hbd * in_bytes            # q (double buffered)
                + 2 * 2 * T * hbd * in_bytes       # k, v
                + 2 * tq * T * 4                   # mask block
                + 2 * tq * hbd * out_bytes         # context out
                + tq * T * 4                       # live score tile
                + (1 << 20))

    for hb in sorted(cands, reverse=True):
        for tq_target in (512, 256, 128, 64, 32, 16, 8):
            tq = _pick_tile(T, min(tq_target, T), 8)
            if est(hb, tq) <= budget:
                return hb, tq, est(hb, tq)
    hb = min(cands)
    tq = _pick_tile(T, 8, 8)
    return hb, tq, est(hb, tq)


def attention(q2d, k2d, v2d, mask_btt, config, *, B, T, H, D, out_dtype):
    E = H * D
    acfg = config["bmm_attention"]
    ccfg = config["bmm_context"]
    ocfg = config["out_proj"]
    use_bf16 = _exact_in_bf16(acfg["data_in_width"], acfg["weight_width"],
                              ccfg["data_in_width"], ccfg["weight_width"])
    in_bytes = max(q2d.dtype.itemsize, k2d.dtype.itemsize, v2d.dtype.itemsize)
    hb, tq, est = _attn_tiles(B, T, H, D, in_bytes, jnp.dtype(out_dtype).itemsize)
    n_groups = H // hb
    nq = T // tq

    kern = functools.partial(
        attn_kernel, n_heads_blk=hb, head_dim=D,
        pw=ccfg["data_in_width"], pf=ccfg["data_in_frac_width"],
        ow=ocfg["data_in_width"], of=ocfg["data_in_frac_width"],
        use_bf16=use_bf16)

    blk_q = (tq, hb * D)
    blk_kv = (T, hb * D)
    return pl.pallas_call(
        kern,
        out_shape=jax.ShapeDtypeStruct((B * T, E), out_dtype),
        grid=(B, n_groups, nq),
        in_specs=[
            pl.BlockSpec(blk_q, lambda b, g, qi: (b * nq + qi, g)),
            pl.BlockSpec(blk_kv, lambda b, g, qi: (b, g)),
            pl.BlockSpec(blk_kv, lambda b, g, qi: (b, g)),
            # the additive mask is part of the module interface; it is streamed
            # in (1, tq, S) blocks so it is never fully VMEM-resident.
            # TODO(synk): callers that only need causal masking should generate
            # it in-kernel (broadcasted_iota) instead of DMAing B*T*T floats.
            pl.BlockSpec((1, tq, T), lambda b, g, qi: (b, qi, 0)),
        ],
        out_specs=pl.BlockSpec(blk_q, lambda b, g, qi: (b * nq + qi, g)),
        compiler_params=pltpu.CompilerParams(
            dimension_semantics=("parallel", "parallel", "parallel"),
            vmem_limit_bytes=_vmem_limit(est)),
    )(q2d, k2d, v2d, mask_btt)


# ---------------------------------------------------------------------------
# Full OPTAttentionInteger forward.  `prep` comes from prepare_params().
# ---------------------------------------------------------------------------
def opt_attention_integer(hidden, attention_mask, prep, config, num_heads):
    B, T, E = hidden.shape
    H = num_heads
    D = E // H
    assert D * H == E
    assert attention_mask.shape == (B, 1, T, T)
    if B > 1:
        assert T % 8 == 0, "batched attention tiling needs seq_len % 8 == 0"
    scaling = float(D) ** -0.5

    acfg = config["bmm_attention"]
    ccfg = config["bmm_context"]
    ocfg = config["out_proj"]
    qkv_mode = prep["qkv_mode"]
    out_mode = prep["out_mode"]

    x2d = hidden.reshape(B * T, E)

    # Pre-quantize the activations once (tiny elementwise pass) when q/k/v share
    # the same data_in quantizer; the QKV kernel then streams 1/2-byte x.
    in_cfgs = tuple((config[n]["data_in_width"], config[n]["data_in_frac_width"])
                    for n in ("q_proj", "k_proj", "v_proj"))
    if len(set(in_cfgs)) == 1:
        w_in, f_in = in_cfgs[0]
        if qkv_mode == "int8":
            x_in = _quant_to_int8(x2d, w_in, f_in)
        elif qkv_mode == "bf16":
            x_in = int_quant(x2d, w_in, f_in).astype(jnp.bfloat16)
        else:
            x_in = int_quant(x2d, w_in, f_in)
        in_q = (None, None, None)
    else:
        x_in = x2d
        in_q = in_cfgs

    # q/k/v leave the fused projection already quantized for the attention bmms
    q_dt = jnp.bfloat16 if acfg["data_in_width"] <= 8 else jnp.float32
    k_dt = jnp.bfloat16 if acfg["weight_width"] <= 8 else jnp.float32
    v_dt = jnp.bfloat16 if ccfg["weight_width"] <= 8 else jnp.float32
    q2d, k2d, v2d = fused_qkv_proj(x_in, prep, config, scaling, in_q,
                                   (q_dt, k_dt, v_dt))

    ctx_dt = jnp.bfloat16 if ocfg["data_in_width"] <= 8 else jnp.float32
    mask3 = attention_mask.reshape(B, T, T).astype(jnp.float32)
    ctx = attention(q2d, k2d, v2d, mask3, config,
                    B=B, T=T, H=H, D=D, out_dtype=ctx_dt)

    # ctx already carries out_proj's data_in quantizer; for the int8 MXU path
    # just re-express the (exact) values as int8 codes.
    if out_mode == "int8":
        ctx = _quant_to_int8(ctx.astype(jnp.float32),
                             ocfg["data_in_width"], ocfg["data_in_frac_width"])
    out = quant_linear(ctx, prep["out_proj"]["wt"], prep["out_proj"]["b"],
                       mode=out_mode, acc_scale=prep["out_proj"]["acc_scale"])
    return out.reshape(B, T, E), None   # (attn_output, attn_weights_reshaped)


# ---------------------------------------------------------------------------
# Pure-JAX reference (same quantized semantics) for a sanity check
# ---------------------------------------------------------------------------
def ref_forward(hidden, attention_mask, params, config, H):
    B, T, E = hidden.shape
    D = E // H
    scaling = float(D) ** -0.5

    def lin(x, w, b, cfg):
        return (
            jnp.einsum("...k,nk->...n",
                       int_quant(x, cfg["data_in_width"], cfg["data_in_frac_width"]),
                       int_quant(w, cfg["weight_width"], cfg["weight_frac_width"]),
                       precision=jax.lax.Precision.HIGHEST)
            + int_quant(b, cfg["bias_width"], cfg["bias_frac_width"])
        )

    q = lin(hidden, params["q_w"], params["q_b"], config["q_proj"]) * scaling
    k = lin(hidden, params["k_w"], params["k_b"], config["k_proj"])
    v = lin(hidden, params["v_w"], params["v_b"], config["v_proj"])

    def sh(x):
        return x.reshape(B, T, H, D).transpose(0, 2, 1, 3)

    qh, kh, vh = sh(q), sh(k), sh(v)
    a, c = config["bmm_attention"], config["bmm_context"]
    s = jnp.einsum("bhtd,bhsd->bhts",
                   int_quant(qh, a["data_in_width"], a["data_in_frac_width"]),
                   int_quant(kh, a["weight_width"], a["weight_frac_width"]),
                   precision=jax.lax.Precision.HIGHEST)
    s = s + attention_mask
    s = jnp.maximum(s, jnp.finfo(jnp.float32).min)
    p = jax.nn.softmax(s, axis=-1)
    ctx = jnp.einsum("bhts,bhsd->bhtd",
                     int_quant(p, c["data_in_width"], c["data_in_frac_width"]),
                     int_quant(vh, c["weight_width"], c["weight_frac_width"]),
                     precision=jax.lax.Precision.HIGHEST)
    ctx = ctx.transpose(0, 2, 1, 3).reshape(B, T, E)
    return lin(ctx, params["out_w"], params["out_b"], config["out_proj"])


if __name__ == "__main__":
    # small but tile-friendly shapes: embed 128, 4 heads of 32 (lane-dense head
    # group 4*32 = 128), seq 16, batch 2
    B, T, E, H = 2, 16, 128, 4

    default_cfg = dict(data_in_width=8, data_in_frac_width=4,
                       weight_width=8, weight_frac_width=4,
                       bias_width=8, bias_frac_width=4)
    config = {name: dict(default_cfg) for name in
              ["q_proj", "k_proj", "v_proj", "out_proj",
               "bmm_attention", "bmm_context"]}

    key = jax.random.PRNGKey(0)
    keys = jax.random.split(key, 10)

    def init_linear(kw, kb):
        w = jax.random.normal(kw, (E, E), jnp.float32) * 0.05
        b = jax.random.normal(kb, (E,), jnp.float32) * 0.05
        return w, b

    q_w, q_b = init_linear(keys[0], keys[1])
    k_w, k_b = init_linear(keys[2], keys[3])
    v_w, v_b = init_linear(keys[4], keys[5])
    o_w, o_b = init_linear(keys[6], keys[7])
    params = dict(q_w=q_w, q_b=q_b, k_w=k_w, k_b=k_b,
                  v_w=v_w, v_b=v_b, out_w=o_w, out_b=o_b)

    hidden = jax.random.normal(keys[8], (B, T, E), jnp.float32)
    # additive causal mask, shape (B, 1, T, T) as the module asserts
    causal = jnp.where(jnp.tril(jnp.ones((T, T), dtype=bool)),
                       0.0, jnp.finfo(jnp.float32).min).astype(jnp.float32)
    attention_mask = jnp.broadcast_to(causal, (B, 1, T, T))

    # weight/bias quantization + transpose + cast hoisted out of the forward
    prep = prepare_params(params, config)

    out, attn_weights = opt_attention_integer(hidden, attention_mask, prep, config, H)
    out = jax.block_until_ready(out)

    ref = np.asarray(jax.block_until_ready(
        ref_forward(hidden, attention_mask, params, config, H)))
    err = np.abs(np.asarray(out) - ref)
    # Only intended deviation from the exact reference: the EUP approximate
    # reciprocal in the softmax denominator, which can flip the 8-bit
    # quantization of an attention probability by at most one LSB (2^-4).
    assert err.max() < 6e-2, f"max err {err.max()}"
    assert err.mean() < 5e-3, f"mean err {err.mean()}"
    assert out.shape == (B, T, E) and attn_weights is None
    print("KERNEL_OK")
</pallas_src>

<mosaic_0001>
module attributes {stable_mosaic.version = 11 : i64} {
  func.func @_qkv_kernel(%arg0: i32, %arg1: i32, %arg2: i32, %arg3: memref<32x128xbf16, #tpu.memory_space<vmem>>, %arg4: memref<128x128xbf16, #tpu.memory_space<vmem>>, %arg5: memref<128x128xbf16, #tpu.memory_space<vmem>>, %arg6: memref<128x128xbf16, #tpu.memory_space<vmem>>, %arg7: memref<1x128xf32, #tpu.memory_space<vmem>>, %arg8: memref<1x128xf32, #tpu.memory_space<vmem>>, %arg9: memref<1x128xf32, #tpu.memory_space<vmem>>, %arg10: memref<32x128xbf16, #tpu.memory_space<vmem>>, %arg11: memref<32x128xbf16, #tpu.memory_space<vmem>>, %arg12: memref<32x128xbf16, #tpu.memory_space<vmem>>, %arg13: memref<32x128xf32, #tpu.memory_space<vmem>>, %arg14: memref<32x128xf32, #tpu.memory_space<vmem>>, %arg15: memref<32x128xf32, #tpu.memory_space<vmem>>) attributes {dimension_semantics = [#tpu.dimension_semantics<parallel>, #tpu.dimension_semantics<parallel>, #tpu.dimension_semantics<arbitrary>], iteration_bounds = array<i64: 1, 1, 1>, scalar_prefetch = 0 : i64, scratch_operands = 3 : i64, tpu.core_type = #tpu.core_type<tc>, window_params = [{transform_indices = @transform_0, window_bounds = array<i64: 32, 128>}, {transform_indices = @transform_1, window_bounds = array<i64: 128, 128>}, {transform_indices = @transform_2, window_bounds = array<i64: 128, 128>}, {transform_indices = @transform_3, window_bounds = array<i64: 128, 128>}, {transform_indices = @transform_4, window_bounds = array<i64: 1, 128>}, {transform_indices = @transform_5, window_bounds = array<i64: 1, 128>}, {transform_indices = @transform_6, window_bounds = array<i64: 1, 128>}, {transform_indices = @transform_7, window_bounds = array<i64: 32, 128>}, {transform_indices = @transform_8, window_bounds = array<i64: 32, 128>}, {transform_indices = @transform_9, window_bounds = array<i64: 32, 128>}]} {
    %c0_i32 = arith.constant 0 : i32
    %0 = arith.cmpi eq, %arg2, %c0_i32 : i32
    %1 = arith.extui %0 : i1 to i32
    %c0_i32_0 = arith.constant 0 : i32
    %2 = arith.cmpi ne, %1, %c0_i32_0 : i32
    scf.if %2 {
      %cst_24 = arith.constant 0.000000e+00 : f32
      %22 = vector.broadcast %cst_24 : f32 to vector<32x128xf32>
      %c0_25 = arith.constant 0 : index
      %c0_26 = arith.constant 0 : index
      %23 = vector.load %arg13[%c0_25, %c0_26] : memref<32x128xf32, #tpu.memory_space<vmem>>, vector<32x128xf32>
      tpu.vector_store %arg13[%c0_25, %c0_26], %22 {strides = array<i32>} : memref<32x128xf32, #tpu.memory_space<vmem>>, vector<32x128xf32>,
      %cst_27 = arith.constant 0.000000e+00 : f32
      %24 = vector.broadcast %cst_27 : f32 to vector<32x128xf32>
      %c0_28 = arith.constant 0 : index
      %c0_29 = arith.constant 0 : index
      %25 = vector.load %arg14[%c0_28, %c0_29] : memref<32x128xf32, #tpu.memory_space<vmem>>, vector<32x128xf32>
      tpu.vector_store %arg14[%c0_28, %c0_29], %24 {strides = array<i32>} : memref<32x128xf32, #tpu.memory_space<vmem>>, vector<32x128xf32>,
      %cst_30 = arith.constant 0.000000e+00 : f32
      %26 = vector.broadcast %cst_30 : f32 to vector<32x128xf32>
      %c0_31 = arith.constant 0 : index
      %c0_32 = arith.constant 0 : index
      %27 = vector.load %arg15[%c0_31, %c0_32] : memref<32x128xf32, #tpu.memory_space<vmem>>, vector<32x128xf32>
      tpu.vector_store %arg15[%c0_31, %c0_32], %26 {strides = array<i32>} : memref<32x128xf32, #tpu.memory_space<vmem>>, vector<32x128xf32>,
    } else {
    }
    %c0 = arith.constant 0 : index
    %c0_1 = arith.constant 0 : index
    %3 = vector.load %arg3[%c0, %c0_1] : memref<32x128xbf16, #tpu.memory_space<vmem>>, vector<32x128xbf16>
    %c0_2 = arith.constant 0 : index
    %c0_3 = arith.constant 0 : index
    %4 = vector.load %arg13[%c0_2, %c0_3] : memref<32x128xf32, #tpu.memory_space<vmem>>, vector<32x128xf32>
    %c0_4 = arith.constant 0 : index
    %c0_5 = arith.constant 0 : index
    %5 = vector.load %arg4[%c0_4, %c0_5] : memref<128x128xbf16, #tpu.memory_space<vmem>>, vector<128x128xbf16>
    %cst = arith.constant dense<0.000000e+00> : vector<32x128xf32>
    %6 = tpu.matmul %3, %5, %cst {dimension_numbers = #tpu.dot_dimension_numbers<[1], [0], [0], [1], [0, 0, 1, 1], [], []>} : vector<32x128xbf16>, vector<128x128xbf16>, vector<32x128xf32> -> vector<32x128xf32>
    %7 = arith.addf %4, %6 : vector<32x128xf32>
    %c0_6 = arith.constant 0 : index
    %c0_7 = arith.constant 0 : index
    %8 = vector.load %arg13[%c0_6, %c0_7] : memref<32x128xf32, #tpu.memory_space<vmem>>, vector<32x128xf32>
    tpu.vector_store %arg13[%c0_6, %c0_7], %7 {strides = array<i32>} : memref<32x128xf32, #tpu.memory_space<vmem>>, vector<32x128xf32>,
    %c0_8 = arith.constant 0 : index
    %c0_9 = arith.constant 0 : index
    %9 = vector.load %arg14[%c0_8, %c0_9] : memref<32x128xf32, #tpu.memory_space<vmem>>, vector<32x128xf32>
    %c0_10 = arith.constant 0 : index
    %c0_11 = arith.constant 0 : index
    %10 = vector.load %arg5[%c0_10, %c0_11] : memref<128x128xbf16, #tpu.memory_space<vmem>>, vector<128x128xbf16>
    %cst_12 = arith.constant dense<0.000000e+00> : vector<32x128xf32>
    %11 = tpu.matmul %3, %10, %cst_12 {dimension_numbers = #tpu.dot_dimension_numbers<[1], [0], [0], [1], [0, 0, 1, 1], [], []>} : vector<32x128xbf16>, vector<128x128xbf16>, vector<32x128xf32> -> vector<32x128xf32>
    %12 = arith.addf %9, %11 : vector<32x128xf32>
    %c0_13 = arith.constant 0 : index
    %c0_14 = arith.constant 0 : index
    %13 = vector.load %arg14[%c0_13, %c0_14] : memref<32x128xf32, #tpu.memory_space<vmem>>, vector<32x128xf32>
    tpu.vector_store %arg14[%c0_13, %c0_14], %12 {strides = array<i32>} : memref<32x128xf32, #tpu.memory_space<vmem>>, vector<32x128xf32>,
    %c0_15 = arith.constant 0 : index
    %c0_16 = arith.constant 0 : index
    %14 = vector.load %arg15[%c0_15, %c0_16] : memref<32x128xf32, #tpu.memory_space<vmem>>, vector<32x128xf32>
    %c0_17 = arith.constant 0 : index
    %c0_18 = arith.constant 0 : index
    %15 = vector.load %arg6[%c0_17, %c0_18] : memref<128x128xbf16, #tpu.memory_space<vmem>>, vector<128x128xbf16>
    %cst_19 = arith.constant dense<0.000000e+00> : vector<32x128xf32>
    %16 = tpu.matmul %3, %15, %cst_19 {dimension_numbers = #tpu.dot_dimension_numbers<[1], [0], [0], [1], [0, 0, 1, 1], [], []>} : vector<32x128xbf16>, vector<128x128xbf16>, vector<32x128xf32> -> vector<32x128xf32>
    %17 = arith.addf %14, %16 : vector<32x128xf32>
    %c0_20 = arith.constant 0 : index
    %c0_21 = arith.constant 0 : index
    %18 = vector.load %arg15[%c0_20, %c0_21] : memref<32x128xf32, #tpu.memory_space<vmem>>, vector<32x128xf32>
    tpu.vector_store %arg15[%c0_20, %c0_21], %17 {strides = array<i32>} : memref<32x128xf32, #tpu.memory_space<vmem>>, vector<32x128xf32>,
    %c0_i32_22 = arith.constant 0 : i32
    %19 = arith.cmpi eq, %arg2, %c0_i32_22 : i32
    %20 = arith.extui %19 : i1 to i32
    %c0_i32_23 = arith.constant 0 : i32
    %21 = arith.cmpi ne, %20, %c0_i32_23 : i32
    scf.if %21 {
      %c0_24 = arith.constant 0 : index
      %c0_25 = arith.constant 0 : index
      %22 = vector.load %arg13[%c0_24, %c0_25] : memref<32x128xf32, #tpu.memory_space<vmem>>, vector<32x128xf32>
      %c0_26 = arith.constant 0 : index
      %c0_27 = arith.constant 0 : index
      %23 = vector.load %arg7[%c0_26, %c0_27] : memref<1x128xf32, #tpu.memory_space<vmem>>, vector<1x128xf32>
      %24 = vector.broadcast %23 : vector<1x128xf32> to vector<32x128xf32>
      %25 = arith.addf %22, %24 : vector<32x128xf32>
      %cst_28 = arith.constant 2.82842708 : f32
      %26 = vector.broadcast %cst_28 : f32 to vector<32x128xf32>
      %27 = arith.mulf %25, %26 : vector<32x128xf32>
      %28 = math.roundeven %27 : vector<32x128xf32>
      %cst_29 = arith.constant -1.280000e+02 : f32
      %cst_30 = arith.constant 1.270000e+02 : f32
      %29 = vector.broadcast %cst_29 : f32 to vector<32x128xf32>
      %30 = arith.maximumf %29, %28 : vector<32x128xf32>
      %31 = vector.broadcast %cst_30 : f32 to vector<32x128xf32>
      %32 = arith.minimumf %31, %30 : vector<32x128xf32>
      %cst_31 = arith.constant 6.250000e-02 : f32
      %33 = vector.broadcast %cst_31 : f32 to vector<32x128xf32>
      %34 = arith.mulf %32, %33 : vector<32x128xf32>
      %35 = arith.truncf %34 : vector<32x128xf32> to vector<32x128xbf16>
      %c0_32 = arith.constant 0 : index
      %c0_33 = arith.constant 0 : index
      %36 = vector.load %arg10[%c0_32, %c0_33] : memref<32x128xbf16, #tpu.memory_space<vmem>>, vector<32x128xbf16>
      tpu.vector_store %arg10[%c0_32, %c0_33], %35 {strides = array<i32>} : memref<32x128xbf16, #tpu.memory_space<vmem>>, vector<32x128xbf16>,
      %c0_34 = arith.constant 0 : index
      %c0_35 = arith.constant 0 : index
      %37 = vector.load %arg14[%c0_34, %c0_35] : memref<32x128xf32, #tpu.memory_space<vmem>>, vector<32x128xf32>
      %c0_36 = arith.constant 0 : index
      %c0_37 = arith.constant 0 : index
      %38 = vector.load %arg8[%c0_36, %c0_37] : memref<1x128xf32, #tpu.memory_space<vmem>>, vector<1x128xf32>
      %39 = vector.broadcast %38 : vector<1x128xf32> to vector<32x128xf32>
      %40 = arith.addf %37, %39 : vector<32x128xf32>
      %cst_38 = arith.constant 1.600000e+01 : f32
      %41 = vector.broadcast %cst_38 : f32 to vector<32x128xf32>
      %42 = arith.mulf %40, %41 : vector<32x128xf32>
      %43 = math.roundeven %42 : vector<32x128xf32>
      %cst_39 = arith.constant -1.280000e+02 : f32
      %cst_40 = arith.constant 1.270000e+02 : f32
      %44 = vector.broadcast %cst_39 : f32 to vector<32x128xf32>
      %45 = arith.maximumf %44, %43 : vector<32x128xf32>
      %46 = vector.broadcast %cst_40 : f32 to vector<32x128xf32>
      %47 = arith.minimumf %46, %45 : vector<32x128xf32>
      %cst_41 = arith.constant 6.250000e-02 : f32
      %48 = vector.broadcast %cst_41 : f32 to vector<32x128xf32>
      %49 = arith.mulf %47, %48 : vector<32x128xf32>
      %50 = arith.truncf %49 : vector<32x128xf32> to vector<32x128xbf16>
      %c0_42 = arith.constant 0 : index
      %c0_43 = arith.constant 0 : index
      %51 = vector.load %arg11[%c0_42, %c0_43] : memref<32x128xbf16, #tpu.memory_space<vmem>>, vector<32x128xbf16>
      tpu.vector_store %arg11[%c0_42, %c0_43], %50 {strides = array<i32>} : memref<32x128xbf16, #tpu.memory_space<vmem>>, vector<32x128xbf16>,
      %c0_44 = arith.constant 0 : index
      %c0_45 = arith.constant 0 : index
      %52 = vector.load %arg15[%c0_44, %c0_45] : memref<32x128xf32, #tpu.memory_space<vmem>>, vector<32x128xf32>
      %c0_46 = arith.constant 0 : index
      %c0_47 = arith.constant 0 : index
      %53 = vector.load %arg9[%c0_46, %c0_47] : memref<1x128xf32, #tpu.memory_space<vmem>>, vector<1x128xf32>
      %54 = vector.broadcast %53 : vector<1x128xf32> to vector<32x128xf32>
      %55 = arith.addf %52, %54 : vector<32x128xf32>
      %cst_48 = arith.constant 1.600000e+01 : f32
      %56 = vector.broadcast %cst_48 : f32 to vector<32x128xf32>
      %57 = arith.mulf %55, %56 : vector<32x128xf32>
      %58 = math.roundeven %57 : vector<32x128xf32>
      %cst_49 = arith.constant -1.280000e+02 : f32
      %cst_50 = arith.constant 1.270000e+02 : f32
      %59 = vector.broadcast %cst_49 : f32 to vector<32x128xf32>
      %60 = arith.maximumf %59, %58 : vector<32x128xf32>
      %61 = vector.broadcast %cst_50 : f32 to vector<32x128xf32>
      %62 = arith.minimumf %61, %60 : vector<32x128xf32>
      %cst_51 = arith.constant 6.250000e-02 : f32
      %63 = vector.broadcast %cst_51 : f32 to vector<32x128xf32>
      %64 = arith.mulf %62, %63 : vector<32x128xf32>
      %65 = arith.truncf %64 : vector<32x128xf32> to vector<32x128xbf16>
      %c0_52 = arith.constant 0 : index
      %c0_53 = arith.constant 0 : index
      %66 = vector.load %arg12[%c0_52, %c0_53] : memref<32x128xbf16, #tpu.memory_space<vmem>>, vector<32x128xbf16>
      tpu.vector_store %arg12[%c0_52, %c0_53], %65 {strides = array<i32>} : memref<32x128xbf16, #tpu.memory_space<vmem>>, vector<32x128xbf16>,
    } else {
    }
    return
  }
  func.func @transform_0(%arg0: i32, %arg1: i32, %arg2: i32) -> (i32, i32) {
    %c0_i32 = arith.constant 0 : i32
    return %arg0, %arg2 : i32, i32
  }
  func.func @transform_1(%arg0: i32, %arg1: i32, %arg2: i32) -> (i32, i32) {
    %c0_i32 = arith.constant 0 : i32
    return %arg2, %arg1 : i32, i32
  }
  func.func @transform_2(%arg0: i32, %arg1: i32, %arg2: i32) -> (i32, i32) {
    %c0_i32 = arith.constant 0 : i32
    return %arg2, %arg1 : i32, i32
  }
  func.func @transform_3(%arg0: i32, %arg1: i32, %arg2: i32) -> (i32, i32) {
    %c0_i32 = arith.constant 0 : i32
    return %arg2, %arg1 : i32, i32
  }
  func.func @transform_4(%arg0: i32, %arg1: i32, %arg2: i32) -> (i32, i32) {
    %c0_i32 = arith.constant 0 : i32
    %c0_i32_0 = arith.constant 0 : i32
    return %c0_i32, %arg1 : i32, i32
  }
  func.func @transform_5(%arg0: i32, %arg1: i32, %arg2: i32) -> (i32, i32) {
    %c0_i32 = arith.constant 0 : i32
    %c0_i32_0 = arith.constant 0 : i32
    return %c0_i32, %arg1 : i32, i32
  }
  func.func @transform_6(%arg0: i32, %arg1: i32, %arg2: i32) -> (i32, i32) {
    %c0_i32 = arith.constant 0 : i32
    %c0_i32_0 = arith.constant 0 : i32
    return %c0_i32, %arg1 : i32, i32
  }
  func.func @transform_7(%arg0: i32, %arg1: i32, %arg2: i32) -> (i32, i32) {
    %c0_i32 = arith.constant 0 : i32
    return %arg0, %arg1 : i32, i32
  }
  func.func @transform_8(%arg0: i32, %arg1: i32, %arg2: i32) -> (i32, i32) {
    %c0_i32 = arith.constant 0 : i32
    return %arg0, %arg1 : i32, i32
  }
  func.func @transform_9(%arg0: i32, %arg1: i32, %arg2: i32) -> (i32, i32) {
    %c0_i32 = arith.constant 0 : i32
    return %arg0, %arg1 : i32, i32
  }
}

</mosaic_0001>

<bundles_post_ra>
// kernel: tpu_custom_call.1
= control target key start
LH: loop header
LB: loop body
LE: loop exit
PB: predicated region body
PF: predicated region fallthrough
CT: control target
= control target key end

     0   :  { %15 = vsyncpa [#allocation6], 0  ;;  %s1241_s0 = inlined_call_operand.hbm [shape: bf16[32,128], index: 0, kind: input, shape index: {}]   ;;  %s1242_s1 = inlined_call_operand.hbm [shape: bf16[128,128], index: 1, kind: input, shape index: {}]   ;;  %s1243_s2 = inlined_call_operand.hbm [shape: bf16[128,128], index: 2, kind: input, shape index: {}]   ;;  %s1244_s3 = inlined_call_operand.hbm [shape: bf16[128,128], index: 3, kind: input, shape index: {}]   ;;  %s1245_s4 = inlined_call_operand.vmem [shape: f32[1,128], index: 4, kind: input, shape index: {}]   ;;  %s1246_s5 = inlined_call_operand.vmem [shape: f32[1,128], index: 5, kind: input, shape index: {}]   ;;  %s1247_s6 = inlined_call_operand.vmem [shape: f32[1,128], index: 6, kind: input, shape index: {}]   ;;  %s1248_s7 = inlined_call_operand.hbm [shape: bf16[32,128], index: 7, kind: output, shape index: {0}]   ;;  %s1249_s8 = inlined_call_operand.hbm [shape: bf16[32,128], index: 8, kind: output, shape index: {1}]   ;;  %s1250_s9 = inlined_call_operand.hbm [shape: bf16[32,128], index: 9, kind: output, shape index: {2}]  }
   0x1   :  { %16 = vsyncpa [#allocation9], 0 }
   0x2   :  { %17 = vsyncpa [#allocation12], 0 }
   0x3   :  { %18 = vsyncpa [#allocation7], 0 }
   0x4   :  { %19 = vsyncpa [#allocation15], 0  ;;  %s37_s11 = sshll.u32 %s1242_s1, 4  ;;  %s1047_s12 = smov [#allocation8]   ;;  %s38_s11 = int_to_ptr.hbm [resolvable:$true] %s37_s11 }
   0x5   :  { %s39_s13 = sshll.u32 %s1047_s12, 4  ;;  %s24_s16 = sshll.u32 %s1241_s0, 4  ;;  %s40_s13 = int_to_ptr.vmem [resolvable:$true] %s39_s13  ;;  %s25_s16 = int_to_ptr.hbm [resolvable:$true] %s24_s16 }
   0x6   :  { %s1048_s17 = smov 64   ;;  %s1049_s18 = smov 4  }
   0x7   :  { %45 = dma.hbm_to_vmem [thread:$0]  %s38_s11, 1024, %s40_s13, [#allocation9], %s1048_s17, %s1048_s17, %s1049_s18  }
   0x8   :  { %s1050_s19 = smov [#allocation5]   ;;  %s50_s1 = sshll.u32 %s1243_s2, 4  ;;  %s51_s1 = int_to_ptr.hbm [resolvable:$true] %s50_s1 }
   0x9   :  { %s26_s20 = sshll.u32 %s1050_s19, 4  ;;  %s63_s24 = sshll.u32 %s1244_s3, 4  ;;  %s27_s20 = int_to_ptr.vmem [resolvable:$true] %s26_s20  ;;  %s64_s24 = int_to_ptr.hbm [resolvable:$true] %s63_s24 }
   0xa   :  { %32 = dma.hbm_to_vmem [thread:$0]  %s25_s16, 256, %s27_s20, [#allocation6], %s1048_s17, %s1048_s17, %s1049_s18  }
   0xb   :  { %s1051_s25 = smov [#allocation10]   ;;  %s1052_s27 = smov [#allocation11]  }
   0xc   :  { %s52_s26 = sshll.u32 %s1051_s25, 4  ;;  %s65_s2 = sshll.u32 %s1052_s27, 4  ;;  %s53_s26 = int_to_ptr.vmem [resolvable:$true] %s52_s26  ;;  %s66_s2 = int_to_ptr.vmem [resolvable:$true] %s65_s2 }
   0xd   :  { %58 = dma.hbm_to_vmem [thread:$0]  %s51_s1, 1024, %s53_s26, [#allocation9], %s1048_s17, %s1048_s17, %s1049_s18  }
   0xe   :  { %71 = dma.hbm_to_vmem [thread:$0]  %s64_s24, 1024, %s66_s2, [#allocation12], %s1048_s17, %s1048_s17, %s1049_s18  }
   0xf   :  { %1037 = dma.done.wait [#allocation6], 256  }
  0x10   :  { %1038 = vsyncadd [#allocation6], 4294967040 }
  0x11   :  { %1039 = dma.done.wait [#allocation9], 2048  }
  0x12   :  { %1040 = vsyncadd [#allocation9], 4294965248 }
  0x13   :  { %1041 = dma.done.wait [#allocation12], 1024  }
  0x14   :  { %1042 = vsyncadd [#allocation12], 4294966272  ;;  %v703_v0 = vld [vmem:[#allocation8 + $0x38] sm:$0xff]  ;;  %v702_v3 = vld [vmem:[#allocation8 + $0x30] sm:$0xff]  ;;  %s540_s13 = sshll.u32 %s1248_s7, 4  ;;  %s1054_s7 = smov [#allocation14]   ;;  %s541_s13 = int_to_ptr.hbm [resolvable:$true] %s540_s13 }
  0x15   :  { %v711_v1 = vld [vmem:[#allocation10 + $0x38] sm:$0xff]  ;;  %753 = vmatpush.bf16.msra.mxu3 %v703_v0  ;;  %v710_v4 = vld [vmem:[#allocation10 + $0x30] sm:$0xff]  ;;  %194 = vmatpush.bf16.msra.mxu0 %v703_v0  ;;  %v701_v6 = vld [vmem:[#allocation8 + $0x28] sm:$0xff]  ;;  %s551_s14 = sshll.u32 %s1054_s7, 4  ;;  %s553_s19 = sshll.u32 %s1249_s8, 4  ;;  %s552_s14 = int_to_ptr.vmem [resolvable:$true] %s551_s14  ;;  %s554_s19 = int_to_ptr.hbm [resolvable:$true] %s553_s19 }
  0x16   :  { %v719_v2 = vld [vmem:[#allocation11 + $0x38] sm:$0xff]  ;;  %289 = vmatpush.bf16.msra.mxu1 %v711_v1  ;;  %v718_v5 = vld [vmem:[#allocation11 + $0x30] sm:$0xff]  ;;  %v709_v7 = vld [vmem:[#allocation10 + $0x28] sm:$0xff]  ;;  %s1055_s20 = smov [#allocation16]   ;;  %s566_s1 = sshll.u32 %s1250_s9, 4  ;;  %s567_s1 = int_to_ptr.hbm [resolvable:$true] %s566_s1 }
  0x17   :  { %384 = vmatpush.bf16.msra.mxu2 %v719_v2  ;;  %v717_v8 = vld [vmem:[#allocation11 + $0x28] sm:$0xff]  ;;  %v700_v9 = vld [vmem:[#allocation8 + $0x20] sm:$0xff]  ;;  %v699_v12 = vld [vmem:[#allocation8 + $0x18] sm:$0xff]  ;;  %s564_s21 = sshll.u32 %s1055_s20, 4  ;;  %s565_s21 = int_to_ptr.vmem [resolvable:$true] %s564_s21 }
  0x18   :  { %v708_v10 = vld [vmem:[#allocation10 + $0x20] sm:$0xff]  ;;  %v707_v13 = vld [vmem:[#allocation10 + $0x18] sm:$0xff]  ;;  %v698_v15 = vld [vmem:[#allocation8 + $0x10] sm:$0xff] }
  0x19   :  { %754 = vmatpush.bf16.msra.mxu3 %v702_v3  ;;  %195 = vmatpush.bf16.msra.mxu0 %v702_v3  ;;  %v716_v11 = vld [vmem:[#allocation11 + $0x20] sm:$0xff]  ;;  %v715_v14 = vld [vmem:[#allocation11 + $0x18] sm:$0xff]  ;;  %v706_v16 = vld [vmem:[#allocation10 + $0x10] sm:$0xff] }
  0x1a   :  { %290 = vmatpush.bf16.msra.mxu1 %v710_v4  ;;  %v714_v17 = vld [vmem:[#allocation11 + $0x10] sm:$0xff]  ;;  %v697_v18 = vld [vmem:[#allocation8 + $0x8] sm:$0xff]  ;;  %v696_v21 = vld [vmem:[#allocation8] sm:$0xff] }
  0x1b   :  { %385 = vmatpush.bf16.msra.mxu2 %v718_v5  ;;  %v705_v19 = vld [vmem:[#allocation10 + $0x8] sm:$0xff]  ;;  %v704_v22 = vld [vmem:[#allocation10] sm:$0xff]  ;;  %v695_v24 = vld [vmem:[#allocation5 + $0x8] sm:$0xff] }
  0x1c   :  { %v713_v20 = vld [vmem:[#allocation11 + $0x8] sm:$0xff]  ;;  %v712_v23 = vld [vmem:[#allocation11] sm:$0xff]  ;;  %v694_v25 = vld [vmem:[#allocation5] sm:$0xff] }
  0x1d   :  { %755 = vmatpush.bf16.msra.mxu3 %v701_v6  ;;  %196 = vmatpush.bf16.msra.mxu0 %v701_v6  ;;  %v1133_v26 = vld [vmem:[%s1246_s5] ss:$0 sm:$0xff] }
  0x1e   :  { %291 = vmatpush.bf16.msra.mxu1 %v709_v7  ;;  %v1138_v27 = vld [vmem:[%s1245_s4] ss:$0 sm:$0xff]  ;;  %s1053_s4 = smov [#allocation13]  }
  0x1f   :  { %386 = vmatpush.bf16.msra.mxu2 %v717_v8  ;;  %v1145_v34 = vld [vmem:[%s1247_s6] ss:$0 sm:$0xff]  ;;  %s1216_s5 = sshll.u32 %s1053_s4, 4  ;;  %s539_s5 = int_to_ptr.vmem [resolvable:$true] %s1216_s5 }
  0x21   :  { %756 = vmatpush.bf16.msra.mxu3 %v700_v9  ;;  %197 = vmatpush.bf16.msra.mxu0 %v700_v9 }
  0x22   :  { %292 = vmatpush.bf16.msra.mxu1 %v708_v10 }
  0x23   :  { %387 = vmatpush.bf16.msra.mxu2 %v716_v11 }
  0x25   :  { %757 = vmatpush.bf16.msra.mxu3 %v699_v12  ;;  %198 = vmatpush.bf16.msra.mxu0 %v699_v12 }
  0x26   :  { %293 = vmatpush.bf16.msra.mxu1 %v707_v13 }
  0x27   :  { %388 = vmatpush.bf16.msra.mxu2 %v715_v14 }
  0x29   :  { %758 = vmatpush.bf16.msra.mxu3 %v698_v15  ;;  %199 = vmatpush.bf16.msra.mxu0 %v698_v15 }
  0x2a   :  { %294 = vmatpush.bf16.msra.mxu1 %v706_v16 }
  0x2b   :  { %389 = vmatpush.bf16.msra.mxu2 %v714_v17 }
  0x2d   :  { %759 = vmatpush.bf16.msra.mxu3 %v697_v18  ;;  %200 = vmatpush.bf16.msra.mxu0 %v697_v18 }
  0x2e   :  { %295 = vmatpush.bf16.msra.mxu1 %v705_v19 }
  0x2f   :  { %390 = vmatpush.bf16.msra.mxu2 %v713_v20 }
  0x31   :  { %760 = vmatpush.bf16.msra.mxu3 %v696_v21  ;;  %201 = vmatpush.bf16.msra.mxu0 %v696_v21 }
  0x32   :  { %296 = vmatpush.bf16.msra.mxu1 %v704_v22 }
  0x33   :  { %391 = vmatpush.bf16.msra.mxu2 %v712_v23 }
  0x34   :  { %207 = vmatmul.bf16.vlgmr.msra.gmra.mxu3 %v695_v24  ;;  %202 = vmatmul.bf16.vlgmr.msra.gmra.mxu0 %v694_v25 }
  0x35   :  { %297 = vmatmul.bf16.vlgmr.msra.gmra.mxu1 %v694_v25 }
  0x36   :  { %392 = vmatmul.bf16.vlgmr.msra.gmra.mxu2 %v694_v25 }
  0x45   :  { %302 = vmatmul.bf16.gmra.mxu1 %v695_v24 }
  0x46   :  { %397 = vmatmul.bf16.gmra.mxu2 %v695_v24 }
  0xb1   :  { %v203_v30 = vpop.f32.mrf.mxu0 }
  0xb2   :  { %v298_v28 = vpop.f32.mrf.mxu1  ;;  %v422_v31 = vadd.f32 %v1138_v27, %v203_v30 }
  0xb3   :  { %v462_v29 = vadd.f32 %v1133_v26, %v298_v28 }
  0xb4   :  { %v426_v33 = vmul.f32 2.828427, %v422_v31 }
  0xb5   :  { %v466_v32 = vmul.f32 16.0, %v462_v29 }
  0xb6   :  { %v761_v37 = vand.u32 2147483647, %v426_v33  ;;  %v763_v38 = vcvt.f32.s32 %v426_v33  ;;  %v766_v45 = vand.u32 2147483648, %v426_v33 }
  0xb7   :  { %v795_v35 = vcvt.f32.s32 %v466_v32  ;;  %v793_v36 = vand.u32 2147483647, %v466_v32  ;;  %v208_v39 = vpop.f32.mrf.mxu3  ;;  %v798_v41 = vand.u32 2147483648, %v466_v32 }
  0xb8   :  { %v424_v42 = vadd.f32 %v1138_v27, %v208_v39  ;;  %v764_v44 = vcvt.s32.f32 %v763_v38  ;;  %vm1154_vm1 = vcmp.lt.f32.partialorder %v761_v37, 8388608.0 }
  0xb9   :  { %v796_v40 = vcvt.s32.f32 %v795_v35  ;;  %v393_v43 = vpop.f32.mrf.mxu2  ;;  %v205_v51 = vpop.f32.mrf.mxu0  ;;  %vm1150_vm0 = vcmp.lt.f32.partialorder %v793_v36, 8388608.0 }
  0xba   :  { %v502_v46 = vadd.f32 %v1145_v34, %v393_v43  ;;  %v300_v47 = vpop.f32.mrf.mxu1  ;;  %v428_v49 = vmul.f32 2.828427, %v424_v42  ;;  %v765_v54 = vand.u32 2147483647, %v764_v44  ;;  %v423_v59 = vadd.f32 %v1138_v27, %v205_v51 }
  0xbb   :  { %v797_v48 = vand.u32 2147483647, %v796_v40  ;;  %v463_v50 = vadd.f32 %v1133_v26, %v300_v47 }
  0xbc   :  { %v506_v55 = vmul.f32 16.0, %v502_v46  ;;  %v777_v57 = vand.u32 2147483647, %v428_v49  ;;  %v779_v58 = vcvt.f32.s32 %v428_v49  ;;  %v767_v60 = vor.u32 %v766_v45, %v765_v54 }
  0xbd   :  { %v799_v56 = vor.u32 %v798_v41, %v797_v48  ;;  %v782_v61 = vand.u32 2147483648, %v428_v49  ;;  %v467_v3 = vmul.f32 16.0, %v463_v50  ;;  %v427_v15 = vmul.f32 2.828427, %v423_v59 }
  0xbe   :  { %v825_v62 = vand.u32 2147483647, %v506_v55  ;;  %v827_v63 = vcvt.f32.s32 %v506_v55  ;;  %v780_v1 = vcvt.s32.f32 %v779_v58  ;;  %v830_v2 = vand.u32 2147483648, %v506_v55 }
  0xbf   :  { %v800_v0 = vsel %vm1150_vm0, %v799_v56, %v466_v32  ;;  %v768_v5 = vsel %vm1154_vm1, %v767_v60, %v426_v33  ;;  %vm1163_vm2 = vcmp.lt.f32.partialorder %v777_v57, 8388608.0  ;;  %v803_v11 = vcvt.f32.s32 %v467_v3  ;;  %v210_v16 = vpop.f32.mrf.mxu3 }
  0xc0   :  { %v474_v4 = vmax.f32 %v800_v0, -128.0  ;;  %v828_v7 = vcvt.s32.f32 %v827_v63  ;;  %v1167_v8 = vmax.f32 %v768_v5, -128.0  ;;  %v781_v9 = vand.u32 2147483647, %v780_v1 }
  0xc1   :  { %vm1169_vm3 = vcmp.lt.f32.partialorder %v825_v62, 8388608.0  ;;  %v395_v12 = vpop.f32.mrf.mxu2  ;;  %v801_v14 = vand.u32 2147483647, %v467_v3  ;;  %v804_v20 = vcvt.s32.f32 %v803_v11  ;;  %v806_v21 = vand.u32 2147483648, %v467_v3 }
  0xc2   :  { %v829_v13 = vand.u32 2147483647, %v828_v7  ;;  %v303_v17 = vpop.f32.mrf.mxu1  ;;  %v478_v18 = vmin.f32 %v474_v4, 127.0  ;;  %v783_v19 = vor.u32 %v782_v61, %v781_v9  ;;  %v438_v22 = vmin.f32 %v1167_v8, 127.0 }
  0xc3   :  { %v769_v24 = vand.u32 2147483647, %v427_v15  ;;  %v771_v25 = vcvt.f32.s32 %v427_v15  ;;  %v805_v29 = vand.u32 2147483647, %v804_v20  ;;  %v425_v30 = vadd.f32 %v1138_v27, %v210_v16 }
  0xc4   :  { %v831_v23 = vor.u32 %v830_v2, %v829_v13  ;;  %v784_v28 = vsel %vm1163_vm2, %v783_v19, %v428_v49  ;;  %v503_v31 = vadd.f32 %v1145_v34, %v395_v12  ;;  %v774_v36 = vand.u32 2147483648, %v427_v15 }
  0xc5   :  { %v1178_v32 = vmax.f32 %v784_v28, -128.0  ;;  %v772_v35 = vcvt.s32.f32 %v771_v25  ;;  %v807_v38 = vor.u32 %v806_v21, %v805_v29  ;;  %v429_v39 = vmul.f32 2.828427, %v425_v30 }
  0xc6   :  { %v832_v33 = vsel %vm1169_vm3, %v831_v23, %v506_v55  ;;  %v507_v40 = vmul.f32 16.0, %v503_v31  ;;  %vm802_vm4 = vcmp.lt.f32.partialorder %v801_v14, 8388608.0  ;;  %vm1182_vm5 = vcmp.lt.f32.partialorder %v769_v24, 8388608.0 }
  0xc7   :  { %v514_v37 = vmax.f32 %v832_v33, -128.0  ;;  %v773_v42 = vand.u32 2147483647, %v772_v35  ;;  %v464_v27 = vadd.f32 %v1133_v26, %v303_v17  ;;  %v808_v44 = vsel %vm802_vm4, %v807_v38, %v467_v3 }
  0xc8   :  { %v785_v45 = vand.u32 2147483647, %v429_v39  ;;  %v787_v46 = vcvt.f32.s32 %v429_v39  ;;  %v440_v48 = vmin.f32 %v1178_v32, 127.0  ;;  %v475_v49 = vmax.f32 %v808_v44, -128.0 }
  0xc9   :  { %v518_v43 = vmin.f32 %v514_v37, 127.0  ;;  %v398_v47 = vpop.f32.mrf.mxu2  ;;  %v775_v50 = vor.u32 %v774_v36, %v773_v42  ;;  %v833_v51 = vand.u32 2147483647, %v507_v40  ;;  %v790_v53 = vand.u32 2147483648, %v429_v39 }
  0xca   :  { %v788_v52 = vcvt.s32.f32 %v787_v46  ;;  %v835_v54 = vcvt.f32.s32 %v507_v40  ;;  %v305_v55 = vpop.f32.mrf.mxu1  ;;  %v482_v56 = vmul.f32 0.0625, %v478_v18  ;;  %v479_v58 = vmin.f32 %v475_v49, 127.0 }
  0xcb   :  { %v1188_v57 = vmul.f32 0.0625, %v518_v43  ;;  %v776_v59 = vsel %vm1182_vm5, %v775_v50, %v427_v15  ;;  %vm1192_vm6 = vcmp.lt.f32.partialorder %v785_v45, 8388608.0  ;;  %v468_v0 = vmul.f32 16.0, %v464_v27 }
  0xcc   :  { %v435_v61 = vmax.f32 %v776_v59, -128.0  ;;  %v789_v62 = vand.u32 2147483647, %v788_v52  ;;  %v836_v63 = vcvt.s32.f32 %v835_v54  ;;  %vm1196_vm7 = vcmp.lt.f32.partialorder %v833_v51, 8388608.0 }
  0xcd   :  { %v504_v2 = vadd.f32 %v1145_v34, %v398_v47  ;;  %v465_v3 = vadd.f32 %v1133_v26, %v305_v55  ;;  %v483_v4 = vmul.f32 0.0625, %v479_v58  ;;  %v838_v7 = vand.u32 2147483648, %v507_v40 }
  0xce   :  { %v791_v5 = vor.u32 %v790_v53, %v789_v62  ;;  %v837_v6 = vand.u32 2147483647, %v836_v63  ;;  %v809_v8 = vand.u32 2147483647, %v468_v0  ;;  %v811_v9 = vcvt.f32.s32 %v468_v0 }
  0xcf   :  { %v1202_v10 = vmul.f32 16.0, %v504_v2  ;;  %v469_v11 = vmul.f32 16.0, %v465_v3  ;;  %v442_v12 = vmul.f32 0.0625, %v438_v22  ;;  %v439_v13 = vmin.f32 %v435_v61, 127.0 }
  0xd0   :  { %v792_v14 = vsel %vm1192_vm6, %v791_v5, %v429_v39  ;;  %v839_v15 = vor.u32 %v838_v7, %v837_v6  ;;  %v733_v16 = vpack.c.bf16 %v483_v4, %v482_v56  ;;  %v812_v18 = vcvt.s32.f32 %v811_v9 }
  0xd1   :  { %v437_v17 = vmax.f32 %v792_v14, -128.0  ;;  %v814_v19 = vand.u32 2147483648, %v468_v0  ;;  %v843_v26 = vcvt.f32.s32 %v1202_v10  ;;  %vm1209_vm8 = vcmp.lt.f32.partialorder %v809_v8, 8388608.0  ;;  %v400_v24 = vpop.f32.mrf.mxu2 }
  0xd2   :  { %v840_v20 = vsel %vm1196_vm7, %v839_v15, %v507_v40  ;;  %v841_v22 = vand.u32 2147483647, %v1202_v10  ;;  %v819_v23 = vcvt.f32.s32 %v469_v11  ;;  %734 = vst [vmem:[#allocation14] sm:$0xff] %v733_v16   ;;  %v813_v29 = vand.u32 2147483647, %v812_v18 }
  0xd3   :  { %v441_v25 = vmin.f32 %v437_v17, 127.0  ;;  %v515_v28 = vmax.f32 %v840_v20, -128.0  ;;  %v846_v30 = vand.u32 2147483648, %v1202_v10  ;;  %v844_v31 = vcvt.s32.f32 %v843_v26 }
  0xd4   :  { %v817_v32 = vand.u32 2147483647, %v469_v11  ;;  %v820_v33 = vcvt.s32.f32 %v819_v23  ;;  %v822_v35 = vand.u32 2147483648, %v469_v11  ;;  %v815_v37 = vor.u32 %v814_v19, %v813_v29 }
  0xd5   :  { %v519_v36 = vmin.f32 %v515_v28, 127.0  ;;  %v505_v38 = vadd.f32 %v1145_v34, %v400_v24  ;;  %v443_v39 = vmul.f32 0.0625, %v439_v13  ;;  %v845_v40 = vand.u32 2147483647, %v844_v31 }
  0xd6   :  { %v821_v41 = vand.u32 2147483647, %v820_v33  ;;  %v444_v42 = vmul.f32 0.0625, %v440_v48  ;;  %v445_v27 = vmul.f32 0.0625, %v441_v25  ;;  %v816_v44 = vsel %vm1209_vm8, %v815_v37, %v468_v0 }
  0xd7   :  { %v523_v43 = vmul.f32 0.0625, %v519_v36  ;;  %v509_v45 = vmul.f32 16.0, %v505_v38  ;;  %v723_v46 = vpack.c.bf16 %v443_v39, %v442_v12  ;;  %v476_v34 = vmax.f32 %v816_v44, -128.0 }
  0xd8   :  { %v847_v47 = vor.u32 %v846_v30, %v845_v40  ;;  %v823_v49 = vor.u32 %v822_v35, %v821_v41  ;;  %v728_v50 = vpack.c.bf16 %v445_v27, %v444_v42  ;;  %vm818_vm9 = vcmp.lt.f32.partialorder %v817_v32, 8388608.0 }
  0xd9   :  { %v851_v51 = vcvt.f32.s32 %v509_v45  ;;  %724 = vst [vmem:[#allocation13] sm:$0xff] %v723_v46   ;;  %v743_v52 = vpack.c.bf16 %v523_v43, %v1188_v57  ;;  %vm842_vm10 = vcmp.lt.f32.partialorder %v841_v22, 8388608.0  ;;  %v480_v53 = vmin.f32 %v476_v34, 127.0 }
  0xda   :  { %v824_v48 = vsel %vm818_vm9, %v823_v49, %v469_v11  ;;  %750 = vst [vmem:[#allocation13 + $0x8] sm:$0xff] %v728_v50   ;;  %v848_v54 = vsel %vm842_vm10, %v847_v47, %v1202_v10  ;;  %v849_v58 = vand.u32 2147483647, %v509_v45  ;;  %v854_v61 = vand.u32 2147483648, %v509_v45 }
  0xdb   :  { %v477_v55 = vmax.f32 %v824_v48, -128.0  ;;  %v852_v56 = vcvt.s32.f32 %v851_v51  ;;  %546 = dma.vmem_to_hbm [thread:$0]  %s539_s5, 256, %s541_s13, [#allocation7], %s1048_s17, %s1048_s17, %s1049_s18   ;;  %744 = vst [vmem:[#allocation16] sm:$0xff] %v743_v52   ;;  %v516_v62 = vmax.f32 %v848_v54, -128.0  ;;  %v484_v63 = vmul.f32 0.0625, %v480_v53 }
  0xdc   :  { %vm850_vm11 = vcmp.lt.f32.partialorder %v849_v58, 8388608.0 }
  0xdd   :  { %v481_v59 = vmin.f32 %v477_v55, 127.0  ;;  %v853_v60 = vand.u32 2147483647, %v852_v56  ;;  %v520_v3 = vmin.f32 %v516_v62, 127.0 }
  0xdf   :  { %v855_v57 = vor.u32 %v854_v61, %v853_v60  ;;  %v485_v0 = vmul.f32 0.0625, %v481_v59  ;;  %v524_v6 = vmul.f32 0.0625, %v520_v3 }
  0xe1   :  { %v856_v1 = vsel %vm850_vm11, %v855_v57, %v509_v45  ;;  %v738_v2 = vpack.c.bf16 %v485_v0, %v484_v63 }
  0xe2   :  { %v517_v4 = vmax.f32 %v856_v1, -128.0 }
  0xe3   :  { %751 = vst [vmem:[#allocation14 + $0x8] sm:$0xff] %v738_v2  }
  0xe4   :  { %v521_v5 = vmin.f32 %v517_v4, 127.0  ;;  %559 = dma.vmem_to_hbm [thread:$0]  %s552_s14, 256, %s554_s19, [#allocation15], %s1048_s17, %s1048_s17, %s1049_s18  }
  0xe6   :  { %v525_v7 = vmul.f32 0.0625, %v521_v5 }
  0xe8   :  { %v748_v8 = vpack.c.bf16 %v525_v7, %v524_v6 }
  0xea   :  { %752 = vst [vmem:[#allocation16 + $0x8] sm:$0xff] %v748_v8  }
  0xeb   :  { %572 = dma.vmem_to_hbm [thread:$0]  %s565_s21, 256, %s567_s1, [#allocation15], %s1048_s17, %s1048_s17, %s1049_s18  }
  0xec   :  { %1043 = dma.done.wait [#allocation7], 256  }
  0xed   :  { %1044 = vsyncadd [#allocation7], 4294967040 }
  0xee   :  { %1045 = dma.done.wait [#allocation15], 512  }
  0xef   :  { %1046 = vsyncadd [#allocation15], 4294966784 }
  0xf0   :  { %585 = vsyncpa [#allocation6], 1 }
  0xf1   :  { %586 = vsyncpa [#allocation9], 1 }
  0xf2   :  { %587 = vsyncpa [#allocation12], 1 }
  0xf3   :  { %588 = vsyncpa [#allocation7], 1 }
  0xf4   :  { %589 = vsyncpa [#allocation15], 1 }

</bundles_post_ra>
